<compile_context>
chip_gen: v5e
topology: v5e:2x2
jax: 0.10.0
libtpu: 0.0.40
codegen_flags: <defaults>
</compile_context>

<pallas_src>
import functools

import jax
import jax.numpy as jnp
import numpy as np
from jax.experimental import pallas as pl
from jax.experimental.pallas import tpu as pltpu

# Budget for the double-buffered pair of x blocks (safe on v5e/v6e/v7x).
_X_PAIR_VMEM_BUDGET = 16 << 20


def _round_up(n, m):
    return ((n + m - 1) // m) * m


def _choose_tb(B, S, D, itemsize, x_pair_budget_bytes):
    """Pick batch tile TB (multiple of 8) and padded batch Bp."""
    bp8 = _round_up(max(B, 1), 8)
    row_bytes = S * D * itemsize                      # one batch row of x
    tb_cap = max(8, (x_pair_budget_bytes // (2 * row_bytes)) // 8 * 8)
    tb_cap = min(tb_cap, bp8)
    # Keep >= 2 grid steps when the batch allows it, so the single 'parallel'
    # axis can be sharded across v7x's two TensorCores.
    if bp8 >= 16:
        tb_cap = min(tb_cap, _round_up((bp8 + 1) // 2, 8))
    tb_cap = max(tb_cap, 8)

    best_tb, best_bp = 8, bp8
    for tb in range(8, tb_cap + 1, 8):
        bp = _round_up(bp8, tb)
        waste = bp - bp8
        # Cap batch-pad waste at ~12.5% while preferring larger tiles.
        if tb != 8 and waste * 8 > bp:
            continue
        if bp < best_bp or (bp == best_bp and tb > best_tb):
            best_tb, best_bp = tb, bp
    return best_tb, best_bp


def _attn_kernel(lens_ref, x_ref, wq_ref, wv_ref, bv_ref, o_ref, *, stabilize):
    x = x_ref[...].astype(jnp.float32)                       # (S, TB, D) f32
    S, TB, _ = x.shape

    # Attention energies with the global query folded into the key projection.
    e = jnp.sum(x * wq_ref[...], axis=-1, keepdims=True)     # (S, TB, 1)

    # Valid-prefix mask along the time (leading) axis.
    pos = jax.lax.broadcasted_iota(jnp.int32, (S, TB, 1), 0)
    mask = pos < lens_ref[...]                               # (1, TB, 1) bcast

    if stabilize:
        # Opt-in: mathematically identical, avoids exp overflow.
        m = jnp.max(jnp.where(mask, e, -jnp.inf), axis=0, keepdims=True)
        e = e - m

    # Un-stabilized masked softmax numerator (matches the torch reference).
    w = jnp.where(mask, jnp.exp(e), 0.0)                     # (S, TB, 1)
    s = jnp.sum(w, axis=0)                                   # (TB, 1)

    # Context-first contraction; normalize after contraction (EUP reciprocal).
    # NOTE: lengths == 0 yields 0/0 NaN, exactly like the reference.
    c = jnp.sum(x * w, axis=0)                               # (TB, D)
    c = c * pl.reciprocal(s)                                 # (TB, D)

    out = jnp.dot(c, wv_ref[...], preferred_element_type=jnp.float32) + bv_ref[...]
    o_ref[...] = out.astype(o_ref.dtype)                     # (TB, OP)


def global_attention_head(embs_sbd, lengths, wk, bk, wv, bv, global_query, *,
                          x_dtype=jnp.bfloat16, stabilize=False):
    """embs_sbd: (S, B, inp_dim); lengths: (B,); returns (B, out_dim) float32."""
    S, B, D = embs_sbd.shape
    O = wv.shape[0]
    del bk  # key bias adds a constant energy per position; cancels in softmax.

    # Fold the global query into the key projection: energies = x @ (Wk^T @ q).
    wq = (wk.T.astype(jnp.float32) @ global_query.astype(jnp.float32)).reshape(1, 1, D)

    # Pad out_dim to a lane-dense multiple of 128 (weights/bias only).
    OP = _round_up(O, 128)
    wv_t = jnp.zeros((D, OP), jnp.float32).at[:, :O].set(wv.T.astype(jnp.float32))
    bv_p = jnp.zeros((1, OP), jnp.float32).at[:, :O].set(bv.astype(jnp.float32))

    itemsize = jnp.dtype(x_dtype).itemsize
    TB, Bp = _choose_tb(B, S, D, itemsize, _X_PAIR_VMEM_BUDGET)

    # Keep x time-major (no transpose); fuse the dtype cast into the batch pad.
    x = embs_sbd.astype(x_dtype)
    lens = lengths.astype(jnp.int32)
    if Bp != B:
        x = jnp.pad(x, ((0, 0), (0, Bp - B), (0, 0)))
        lens = jnp.pad(lens, (0, Bp - B), constant_values=1)
    lens = lens.reshape(1, Bp, 1)

    # Explicit scoped-VMEM limit (v5e default is only 16 MiB; v7x phys 64 MiB).
    x_blk = S * TB * D * itemsize
    out_blk = TB * OP * 4
    needed = 2 * x_blk + 2 * out_blk + (D * OP + OP + D) * 4 + 2 * TB * 4
    vmem_limit = int(min(60 << 20, max(16 << 20, int(needed * 1.5) + (2 << 20))))

    kernel = functools.partial(_attn_kernel, stabilize=stabilize)

    out = pl.pallas_call(
        kernel,
        out_shape=jax.ShapeDtypeStruct((Bp, OP), jnp.float32),
        grid_spec=pltpu.PrefetchScalarGridSpec(
            num_scalar_prefetch=0,
            grid=(Bp // TB,),
            in_specs=[
                pl.BlockSpec((1, TB, 1), lambda i: (0, i, 0)),   # lengths
                pl.BlockSpec((S, TB, D), lambda i: (0, i, 0)),   # x (time-major)
                pl.BlockSpec((1, 1, D), lambda i: (0, 0, 0)),    # Wk^T @ q
                pl.BlockSpec((D, OP), lambda i: (0, 0)),         # Wv^T (padded)
                pl.BlockSpec((1, OP), lambda i: (0, 0)),         # bv   (padded)
            ],
            out_specs=pl.BlockSpec((TB, OP), lambda i: (i, 0)),
        ),
        compiler_params=pltpu.CompilerParams(
            dimension_semantics=("parallel",),
            vmem_limit_bytes=vmem_limit),
    )(lens, x, wq, wv_t, bv_p)

    return out[:B, :O]


def _reference(embs_sbd, lengths, wk, bk, wv, bv, gq):
    S, B, D = embs_sbd.shape
    outs = []
    for b in range(B):
        L = int(lengths[b])
        seq = np.asarray(embs_sbd)[:L, b, :]
        keys = seq @ np.asarray(wk).T + np.asarray(bk)
        vals = seq @ np.asarray(wv).T + np.asarray(bv)
        e = keys @ np.asarray(gq)
        w = np.exp(e)
        w = w / w.sum()
        outs.append(vals.T @ w)
    return np.stack(outs)


if __name__ == "__main__":
    # Small shapes implied by the module: seq=8, batch=2, inp_dim=32, out_dim=32
    # query_dim defaults to max(inp_dim, out_dim) = 32.
    S, B, INP, OUT = 8, 2, 32, 32
    Q = max(INP, OUT)

    key = jax.random.PRNGKey(0)
    k_emb, k_wk, k_bk, k_wv, k_bv = jax.random.split(key, 5)

    embs = jax.random.normal(k_emb, (S, B, INP), dtype=jnp.float32)
    lengths = jnp.array([8, 5], dtype=jnp.int32)

    # Deterministic synthetic parameters (module's __init__ gives shapes).
    wk = 0.1 * jax.random.normal(k_wk, (Q, INP), dtype=jnp.float32)   # key Linear weight
    bk = 0.1 * jax.random.normal(k_bk, (Q,), dtype=jnp.float32)       # key Linear bias
    wv = 0.1 * jax.random.normal(k_wv, (OUT, INP), dtype=jnp.float32) # value Linear weight
    bv = 0.1 * jax.random.normal(k_bv, (OUT,), dtype=jnp.float32)     # value Linear bias
    gq = jnp.ones((Q,), dtype=jnp.float32)                            # global_query_weights = ones

    # Strict check: f32 HBM path against the full-precision reference.
    out_f32 = global_attention_head(embs, lengths, wk, bk, wv, bv, gq,
                                    x_dtype=jnp.float32)
    out_f32 = jax.block_until_ready(out_f32)
    ref_f32 = _reference(embs, lengths, wk, bk, wv, bv, gq)
    np.testing.assert_allclose(np.asarray(out_f32), ref_f32, rtol=1e-5, atol=1e-5)

    # Default bf16-input path (halved x DMA bytes); compare against a reference
    # evaluated on the same bf16-rounded inputs (kernel math stays f32).
    out_bf16 = global_attention_head(embs, lengths, wk, bk, wv, bv, gq)
    out_bf16 = jax.block_until_ready(out_bf16)
    embs_bf16 = embs.astype(jnp.bfloat16).astype(jnp.float32)
    ref_bf16 = _reference(embs_bf16, lengths, wk, bk, wv, bv, gq)
    np.testing.assert_allclose(np.asarray(out_bf16), ref_bf16, rtol=1e-3, atol=1e-3)

    print("KERNEL_OK")
</pallas_src>

<mosaic_0001>
module attributes {stable_mosaic.version = 11 : i64} {
  func.func @_attn_kernel(%arg0: i32, %arg1: memref<1x8x1xi32, #tpu.memory_space<vmem>>, %arg2: memref<8x8x32xf32, #tpu.memory_space<vmem>>, %arg3: memref<1x1x32xf32, #tpu.memory_space<vmem>>, %arg4: memref<32x128xf32, #tpu.memory_space<vmem>>, %arg5: memref<1x128xf32, #tpu.memory_space<vmem>>, %arg6: memref<8x128xf32, #tpu.memory_space<vmem>>) attributes {dimension_semantics = [#tpu.dimension_semantics<parallel>], iteration_bounds = array<i64: 1>, scalar_prefetch = 0 : i64, scratch_operands = 0 : i64, tpu.core_type = #tpu.core_type<tc>, window_params = [{transform_indices = @transform_0, window_bounds = array<i64: 1, 8, 1>}, {transform_indices = @transform_1, window_bounds = array<i64: 8, 8, 32>}, {pipeline_mode = #tpu.pipeline_mode<synchronous>, transform_indices = @transform_2, window_bounds = array<i64: 1, 1, 32>}, {pipeline_mode = #tpu.pipeline_mode<synchronous>, transform_indices = @transform_3, window_bounds = array<i64: 32, 128>}, {pipeline_mode = #tpu.pipeline_mode<synchronous>, transform_indices = @transform_4, window_bounds = array<i64: 1, 128>}, {transform_indices = @transform_5, window_bounds = array<i64: 8, 128>}]} {
    %c0 = arith.constant 0 : index
    %c0_0 = arith.constant 0 : index
    %c0_1 = arith.constant 0 : index
    %0 = vector.load %arg2[%c0, %c0_0, %c0_1] : memref<8x8x32xf32, #tpu.memory_space<vmem>>, vector<8x8x32xf32>
    %c0_2 = arith.constant 0 : index
    %c0_3 = arith.constant 0 : index
    %c0_4 = arith.constant 0 : index
    %1 = vector.load %arg3[%c0_2, %c0_3, %c0_4] : memref<1x1x32xf32, #tpu.memory_space<vmem>>, vector<1x1x32xf32>
    %2 = vector.broadcast %1 : vector<1x1x32xf32> to vector<8x8x32xf32>
    %3 = arith.mulf %0, %2 : vector<8x8x32xf32>
    %cst = arith.constant dense<0.000000e+00> : vector<8x8xf32>
    %4 = vector.multi_reduction <add>, %3, %cst [2] : vector<8x8x32xf32> to vector<8x8xf32>
    %5 = vector.shape_cast %4 : vector<8x8xf32> to vector<8x8x1xf32>
    %6 = tpu.iota {dimensions = array<i32: 0>} : vector<8x8x1xi32>
    %c0_5 = arith.constant 0 : index
    %c0_6 = arith.constant 0 : index
    %c0_7 = arith.constant 0 : index
    %7 = vector.load %arg1[%c0_5, %c0_6, %c0_7] : memref<1x8x1xi32, #tpu.memory_space<vmem>>, vector<1x8x1xi32>
    %8 = vector.broadcast %7 : vector<1x8x1xi32> to vector<8x8x1xi32>
    %9 = arith.cmpi slt, %6, %8 : vector<8x8x1xi32>
    %10 = math.exp %5 : vector<8x8x1xf32>
    %cst_8 = arith.constant 0.000000e+00 : f32
    %11 = vector.broadcast %cst_8 : f32 to vector<8x8x1xf32>
    %12 = arith.select %9, %10, %11 : vector<8x8x1xi1>, vector<8x8x1xf32>
    %cst_9 = arith.constant dense<0.000000e+00> : vector<8x1xf32>
    %13 = vector.multi_reduction <add>, %12, %cst_9 [0] : vector<8x8x1xf32> to vector<8x1xf32>
    %14 = vector.broadcast %12 : vector<8x8x1xf32> to vector<8x8x32xf32>
    %15 = arith.mulf %0, %14 : vector<8x8x32xf32>
    %cst_10 = arith.constant dense<0.000000e+00> : vector<8x32xf32>
    %16 = vector.multi_reduction <add>, %15, %cst_10 [0] : vector<8x8x32xf32> to vector<8x32xf32>
    %17 = tpu.reciprocal %13 : vector<8x1xf32> -> vector<8x1xf32>
    %18 = vector.broadcast %17 : vector<8x1xf32> to vector<8x32xf32>
    %19 = arith.mulf %16, %18 : vector<8x32xf32>
    %c0_11 = arith.constant 0 : index
    %c0_12 = arith.constant 0 : index
    %20 = vector.load %arg4[%c0_11, %c0_12] : memref<32x128xf32, #tpu.memory_space<vmem>>, vector<32x128xf32>
    %cst_13 = arith.constant dense<0.000000e+00> : vector<8x128xf32>
    %21 = tpu.matmul %19, %20, %cst_13 {dimension_numbers = #tpu.dot_dimension_numbers<[1], [0], [0], [1], [0, 0, 1, 1], [], []>} : vector<8x32xf32>, vector<32x128xf32>, vector<8x128xf32> -> vector<8x128xf32>
    %c0_14 = arith.constant 0 : index
    %c0_15 = arith.constant 0 : index
    %22 = vector.load %arg5[%c0_14, %c0_15] : memref<1x128xf32, #tpu.memory_space<vmem>>, vector<1x128xf32>
    %23 = vector.broadcast %22 : vector<1x128xf32> to vector<8x128xf32>
    %24 = arith.addf %21, %23 : vector<8x128xf32>
    %c0_16 = arith.constant 0 : index
    %c0_17 = arith.constant 0 : index
    %25 = vector.load %arg6[%c0_16, %c0_17] : memref<8x128xf32, #tpu.memory_space<vmem>>, vector<8x128xf32>
    tpu.vector_store %arg6[%c0_16, %c0_17], %24 {strides = array<i32>} : memref<8x128xf32, #tpu.memory_space<vmem>>, vector<8x128xf32>,
    return
  }
  func.func @transform_0(%arg0: i32) -> (i32, i32, i32) {
    %c0_i32 = arith.constant 0 : i32
    %c0_i32_0 = arith.constant 0 : i32
    %c0_i32_1 = arith.constant 0 : i32
    return %c0_i32, %arg0, %c0_i32_0 : i32, i32, i32
  }
  func.func @transform_1(%arg0: i32) -> (i32, i32, i32) {
    %c0_i32 = arith.constant 0 : i32
    %c0_i32_0 = arith.constant 0 : i32
    %c0_i32_1 = arith.constant 0 : i32
    return %c0_i32, %arg0, %c0_i32_0 : i32, i32, i32
  }
  func.func @transform_2(%arg0: i32) -> (i32, i32, i32) {
    %c0_i32 = arith.constant 0 : i32
    %c0_i32_0 = arith.constant 0 : i32
    %c0_i32_1 = arith.constant 0 : i32
    %c0_i32_2 = arith.constant 0 : i32
    return %c0_i32, %c0_i32_0, %c0_i32_1 : i32, i32, i32
  }
  func.func @transform_3(%arg0: i32) -> (i32, i32) {
    %c0_i32 = arith.constant 0 : i32
    %c0_i32_0 = arith.constant 0 : i32
    %c0_i32_1 = arith.constant 0 : i32
    return %c0_i32, %c0_i32_0 : i32, i32
  }
  func.func @transform_4(%arg0: i32) -> (i32, i32) {
    %c0_i32 = arith.constant 0 : i32
    %c0_i32_0 = arith.constant 0 : i32
    %c0_i32_1 = arith.constant 0 : i32
    return %c0_i32, %c0_i32_0 : i32, i32
  }
  func.func @transform_5(%arg0: i32) -> (i32, i32) {
    %c0_i32 = arith.constant 0 : i32
    %c0_i32_0 = arith.constant 0 : i32
    return %arg0, %c0_i32 : i32, i32
  }
}

</mosaic_0001>

<bundles_post_ra>
// kernel: tpu_custom_call.1
= control target key start
LH: loop header
LB: loop body
LE: loop exit
PB: predicated region body
PF: predicated region fallthrough
CT: control target
= control target key end

     0   :  { %10 = vsyncpa [#allocation3], 0  ;;  %s499_s0 = inlined_call_operand.vmem [shape: s32[1,8,1], index: 0, kind: input, shape index: {}]   ;;  %s500_s1 = inlined_call_operand.hbm [shape: f32[8,8,32], index: 1, kind: input, shape index: {}]   ;;  %s501_s2 = inlined_call_operand.vmem [shape: f32[1,1,32], index: 2, kind: input, shape index: {}]   ;;  %s502_s3 = inlined_call_operand.hbm [shape: f32[32,128], index: 3, kind: input, shape index: {}]   ;;  %s503_s4 = inlined_call_operand.vmem [shape: f32[1,128], index: 4, kind: input, shape index: {}]   ;;  %s504_s5 = inlined_call_operand.hbm [shape: f32[8,128], index: 5, kind: output, shape index: {}]  }
   0x1   :  { %11 = vsyncpa [#allocation6], 0 }
   0x2   :  { %12 = vsyncpa [#allocation4], 0  ;;  %s19_s20 = sshll.u32 %s500_s1, 4  ;;  %s388_s21 = smov [#allocation2]   ;;  %s20_s20 = int_to_ptr.hbm [resolvable:$true] %s19_s20 }
   0x3   :  { %s21_s22 = sshll.u32 %s388_s21, 4  ;;  %s34_s25 = sshll.u32 %s502_s3, 4  ;;  %s22_s22 = int_to_ptr.vmem [resolvable:$true] %s21_s22  ;;  %s35_s25 = int_to_ptr.hbm [resolvable:$true] %s34_s25 }
   0x4   :  { %s389_s26 = smov 128   ;;  %s390_s27 = smov 8  }
   0x5   :  { %27 = dma.hbm_to_vmem [thread:$0]  %s20_s20, 1024, %s22_s22, [#allocation3], %s389_s26, %s389_s26, %s390_s27  }
   0x6   :  { %s391_s28 = smov [#allocation5]  }
   0x7   :  { %s36_s29 = sshll.u32 %s391_s28, 4  ;;  %s37_s29 = int_to_ptr.vmem [resolvable:$true] %s36_s29 }
   0x8   :  { %42 = dma.hbm_to_vmem [thread:$0]  %s35_s25, 512, %s37_s29, [#allocation6], %s389_s26, %s389_s26, %s390_s27  }
   0x9   :  { %382 = dma.done.wait [#allocation3], 1024  }
   0xa   :  { %383 = vsyncadd [#allocation3], 4294966272 }
   0xb   :  { %384 = dma.done.wait [#allocation6], 512  }
   0xc   :  { %385 = vsyncadd [#allocation6], 4294966784  ;;  %v430_v0 = vld [vmem:[#allocation2 + $0x10] sm:$0xff]  ;;  %v290_v1 = vld [vmem:[%s501_s2] ss:$0 sm:$0xff]  ;;  %vm73_vm0 = vcmask 261120  }
   0xd   :  { %v435_v2 = vld [vmem:[#allocation2] sm:$0xff]  ;;  %v67_v4 = vmul.f32 %v290_v1, %v430_v0  ;;  %v442_v7 = vld [vmem:[#allocation2 + $0x18] sm:$0xff]  ;;  %v444_v8 = vld [vmem:[#allocation2 + $0x8] sm:$0xff]  ;;  %v392_v25 = vmov 0   ;;  %vm131_vm5 = vcmask 7168   ;;  %s393_s7 = smov [#allocation7]  }
   0xe   :  { %v437_v3 = vld [vmem:[#allocation2 + $0x20] sm:$0xff]  ;;  %v65_v5 = vmul.f32 %v290_v1, %v435_v2  ;;  %v449_v12 = vld [vmem:[#allocation2 + $0x28] sm:$0xff]  ;;  %v68_v13 = vmul.f32 %v290_v1, %v442_v7  ;;  %v66_v14 = vmul.f32 %v290_v1, %v444_v8  ;;  %v457_v19 = vld [vmem:[#allocation2 + $0x30] sm:$0xff]  ;;  %287 = vset.pattern.permute.xlu2 %v392_v25  ;;  %289 = vset.pattern.permute.xlu1 %v392_v25  ;;  %s267_s8 = sshll.u32 %s393_s7, 4  ;;  %s269_s11 = sshll.u32 %s504_s5, 4  ;;  %s268_s8 = int_to_ptr.vmem [resolvable:$true] %s267_s8  ;;  %s270_s11 = int_to_ptr.hbm [resolvable:$true] %s269_s11 }
   0xf   :  { %v69_v6 = vmul.f32 %v290_v1, %v437_v3  ;;  %v80_v9 = vsel %vm73_vm0, %v67_v4, 0.0  ;;  %v70_v15 = vmul.f32 %v290_v1, %v449_v12  ;;  %v459_v20 = vld [vmem:[#allocation2 + $0x38] sm:$0xff]  ;;  %v71_v21 = vmul.f32 %v290_v1, %v457_v19  ;;  %288 = vset.pattern.permute.xlu0 %v392_v25  ;;  %v98_v31 = vld [vmem:[%s499_s0] sm:$0xff] }
  0x10   :  { %v74_v10 = vsel %vm73_vm0, %v65_v5, 0.0  ;;  %81 = vadd.xlane.f32.xlu1 %v80_v9  ;;  %v83_v16 = vsel %vm73_vm0, %v68_v13, 0.0  ;;  %v77_v17 = vsel %vm73_vm0, %v66_v14, 0.0  ;;  %v72_v22 = vmul.f32 %v290_v1, %v459_v20 }
  0x11   :  { %v86_v11 = vsel %vm73_vm0, %v69_v6, 0.0  ;;  %75 = vadd.xlane.f32.xlu0 %v74_v10  ;;  %v89_v18 = vsel %vm73_vm0, %v70_v15, 0.0  ;;  %v92_v23 = vsel %vm73_vm0, %v71_v21, 0.0  ;;  %vm101_vm1 = vcmp.gt.s32.totalorder %v98_v31, 2 }
  0x12   :  { %87 = vadd.xlane.f32.xlu2 %v86_v11  ;;  %v95_v24 = vsel %vm73_vm0, %v72_v22, 0.0  ;;  %vm99_vm2 = vcmp.gt.s32.totalorder %v98_v31, 0  ;;  %vm102_vm3 = vcmp.gt.s32.totalorder %v98_v31, 3  ;;  %vm100_vm4 = vcmp.gt.s32.totalorder %v98_v31, 1 }
  0x13   :  { %vm104_vm6 = vcmp.gt.s32.totalorder %v98_v31, 5  ;;  %vm103_vm7 = vcmp.gt.s32.totalorder %v98_v31, 4  ;;  %vm105_vm8 = vcmp.gt.s32.totalorder %v98_v31, 6  ;;  %vm106_vm9 = vcmp.gt.s32.totalorder %v98_v31, 7 }
  0x18   :  { %84 = vadd.xlane.f32.xlu1 %v83_v16 }
  0x19   :  { %78 = vadd.xlane.f32.xlu0 %v77_v17 }
  0x1a   :  { %90 = vadd.xlane.f32.xlu2 %v89_v18 }
  0x20   :  { %96 = vadd.xlane.f32.xlu1 %v95_v24 }
  0x21   :  { %93 = vadd.xlane.f32.xlu0 %v92_v23 }
  0x83   :  { %v82_v26 = vpop.xlane.xlu1 %81 }
  0x84   :  { %v76_v27 = vpop.xlane.xlu0 %75  ;;  %v111_v28 = vmul.f32 1.442695, %v82_v26 }
  0x85   :  { %v107_v29 = vmul.f32 1.442695, %v76_v27  ;;  %v88_v30 = vpop.xlane.xlu2 %87 }
  0x86   :  { %292 = vpow2.f32 %v111_v28  ;;  %v115_v39 = vmul.f32 1.442695, %v88_v30  ;;  %v233_v28 = vld [vmem:[#allocation5 + $0x18] sm:$0xff]  ;;  %v231_v30 = vld [vmem:[#allocation5 + $0x8] sm:$0xff] }
  0x87   :  { %294 = vpow2.f32 %v107_v29  ;;  %v232_v29 = vld [vmem:[#allocation5 + $0x10] sm:$0xff]  ;;  %253 = vmatpush.msra.mxu0 %v233_v28 }
  0x89   :  { %254 = vmatpush.msra.mxu0 %v232_v29 }
  0x8b   :  { %v85_v32 = vpop.xlane.xlu1 %84  ;;  %255 = vmatpush.msra.mxu0 %v231_v30 }
  0x8c   :  { %v79_v33 = vpop.xlane.xlu0 %78  ;;  %v293_v34 = vpop.eup %292  ;;  %v113_v35 = vmul.f32 1.442695, %v85_v32 }
  0x8d   :  { %v109_v36 = vmul.f32 1.442695, %v79_v33  ;;  %v91_v37 = vpop.xlane.xlu2 %90  ;;  %v295_v38 = vpop.eup %294  ;;  %v125_v41 = vsel %vm101_vm1, %v293_v34, 0.0 }
  0x8e   :  { %v117_v40 = vmul.f32 1.442695, %v91_v37  ;;  %296 = vpow2.f32 %v113_v35  ;;  %v123_v42 = vsel %vm99_vm2, %v295_v38, 0.0  ;;  %159 = vperm.xlu1 %289, %v125_v41   ;;  %v135_v57 = vsel %vm131_vm5, %v125_v41, 0.0 }
  0x8f   :  { %298 = vpow2.f32 %v109_v36  ;;  %149 = vperm.xlu2 %287, %v123_v42   ;;  %v132_v53 = vsel %vm131_vm5, %v123_v42, 0.0  ;;  %v230_v36 = vld [vmem:[#allocation5] sm:$0xff] }
  0x90   :  { %300 = vpow2.f32 %v117_v40  ;;  %256 = vmatpush.msra.mxu0 %v230_v36 }
  0x91   :  { %302 = vpow2.f32 %v115_v39 }
  0x93   :  { %v97_v44 = vpop.xlane.xlu1 %96 }
  0x94   :  { %v94_v43 = vpop.xlane.xlu0 %93  ;;  %v297_v45 = vpop.eup %296  ;;  %v121_v47 = vmul.f32 1.442695, %v97_v44 }
  0x95   :  { %v119_v46 = vmul.f32 1.442695, %v94_v43  ;;  %v299_v48 = vpop.eup %298  ;;  %v126_v49 = vsel %vm102_vm3, %v297_v45, 0.0 }
  0x96   :  { %v301_v50 = vpop.eup %300  ;;  %v124_v51 = vsel %vm100_vm4, %v299_v48, 0.0  ;;  %v137_v58 = vsel %vm131_vm5, %v126_v49, 0.0 }
  0x97   :  { %304 = vpow2.f32 %v119_v46  ;;  %v303_v52 = vpop.eup %302  ;;  %164 = vperm.xlu2 %287, %v126_v49   ;;  %154 = vperm.xlu0 %288, %v124_v51   ;;  %v133_v54 = vsel %vm131_vm5, %v124_v51, 0.0  ;;  %v128_v55 = vsel %vm104_vm6, %v301_v50, 0.0 }
  0x98   :  { %306 = vpow2.f32 %v121_v47  ;;  %v134_v56 = vadd.f32 %v133_v54, %v132_v53  ;;  %174 = vperm.xlu1 %289, %v128_v55   ;;  %v127_v60 = vsel %vm103_vm7, %v303_v52, 0.0  ;;  %v141_v1 = vsel %vm131_vm5, %v128_v55, 0.0 }
  0x99   :  { %v139_v4 = vsel %vm131_vm5, %v127_v60, 0.0 }
  0x9a   :  { %v136_v59 = vadd.f32 %v135_v57, %v134_v56 }
  0x9c   :  { %v138_v62 = vadd.f32 %v137_v58, %v136_v59  ;;  %v291_v59 = vld [vmem:[%s503_s4] ss:$0 sm:$0xff] }
  0x9d   :  { %v305_v61 = vpop.eup %304 }
  0x9e   :  { %v307_v63 = vpop.eup %306  ;;  %v129_v5 = vsel %vm105_vm8, %v305_v61, 0.0  ;;  %v140_v6 = vadd.f32 %v139_v4, %v138_v62 }
  0x9f   :  { %v130_v9 = vsel %vm106_vm9, %v307_v63, 0.0  ;;  %169 = vperm.xlu2 %287, %v127_v60   ;;  %v143_v10 = vsel %vm131_vm5, %v129_v5, 0.0 }
  0xa0   :  { %184 = vperm.xlu1 %289, %v130_v9   ;;  %v142_v11 = vadd.f32 %v141_v1, %v140_v6  ;;  %v145_v13 = vsel %vm131_vm5, %v130_v9, 0.0 }
  0xa2   :  { %v144_v14 = vadd.f32 %v143_v10, %v142_v11 }
  0xa4   :  { %v146_v15 = vadd.f32 %v145_v13, %v144_v14 }
  0xa6   :  { %308 = vrcp.f32 %v146_v15  ;;  %v221_v21 = vand.u32 2147483648, %v146_v15  ;;  %v219_v23 = vand.u32 2147483647, %v146_v15  ;;  %vm215_vm11 = vweird.f32 %v146_v15 }
  0xa7   :  { %179 = vperm.xlu2 %287, %v129_v5  }
  0xa8   :  { %v222_v25 = vor.u32 1.1754944e-38, %v221_v21  ;;  %vm220_vm13 = vcmp.eq.f32.partialorder %v219_v23, 8.507059e+37 }
  0xac   :  { %v309_v16 = vpop.eup %308 }
  0xad   :  { %v211_v17 = vmul.f32 %v309_v16, %v146_v15  ;;  %vm216_vm10 = vweird.f32 %v309_v16 }
  0xae   :  { %vm217_vm12 = vmor %vm215_vm11, %vm216_vm10 }
  0xaf   :  { %v212_v18 = vsub.f32 1.0, %v211_v17 }
  0xb1   :  { %v213_v22 = vmul.f32 %v309_v16, %v212_v18 }
  0xb3   :  { %v214_v24 = vadd.f32 %v309_v16, %v213_v22 }
  0xb5   :  { %v218_v26 = vsel %vm217_vm12, %v309_v16, %v214_v24 }
  0xb6   :  { %v223_v27 = vsel %vm220_vm13, %v222_v25, %v218_v26 }
  0xb7   :  { %226 = vperm.xlu0 %288, %v223_v27  }
  0xe9   :  { %v150_v31 = vpop.permute.xlu2 %149 }
  0xea   :  { %v187_v37 = vmul.f32 %v150_v31, %v435_v2 }
  0xec   :  { %v195_v39 = vsel %vm73_vm0, %v187_v37, 0.0 }
  0xf1   :  { %v165_v32 = vpop.permute.xlu2 %164 }
  0xf2   :  { %v190_v43 = vmul.f32 %v165_v32, %v442_v7 }
  0xf9   :  { %v170_v42 = vpop.permute.xlu2 %169 }
  0xfa   :  { %v191_v47 = vmul.f32 %v170_v42, %v437_v3 }
  0xfc   :  { %v202_v49 = vsel %vm73_vm0, %v191_v47, 0.0 }
 0x100   :  { %v160_v34 = vpop.permute.xlu1 %159 }
 0x101   :  { %v189_v40 = vmul.f32 %v160_v34, %v430_v0  ;;  %v180_v50 = vpop.permute.xlu2 %179 }
 0x102   :  { %v193_v7 = vmul.f32 %v180_v50, %v457_v19 }
 0x103   :  { %v198_v44 = vsel %vm73_vm0, %v189_v40, 0.0 }
 0x104   :  { %v206_v55 = vsel %vm73_vm0, %v193_v7, 0.0 }
 0x109   :  { %v155_v33 = vpop.permute.xlu0 %154 }
 0x10a   :  { %v188_v35 = vmul.f32 %v155_v33, %v444_v8  ;;  %v175_v46 = vpop.permute.xlu1 %174  ;;  %v200_v8 = vsel %vm73_vm0, %v190_v43, 0.0 }
 0x10b   :  { %v192_v48 = vmul.f32 %v175_v46, %v449_v12 }
 0x10c   :  { %v196_v38 = vsel %vm73_vm0, %v188_v35, 0.0 }
 0x10d   :  { %v197_v41 = vadd.f32 %v196_v38, %v195_v39  ;;  %v204_v0 = vsel %vm73_vm0, %v192_v48, 0.0 }
 0x10f   :  { %v199_v45 = vadd.f32 %v198_v44, %v197_v41 }
 0x111   :  { %v201_v2 = vadd.f32 %v200_v8, %v199_v45 }
 0x112   :  { %v185_v52 = vpop.permute.xlu1 %184 }
 0x113   :  { %v203_v51 = vadd.f32 %v202_v49, %v201_v2  ;;  %v194_v54 = vmul.f32 %v185_v52, %v459_v20 }
 0x115   :  { %v205_v53 = vadd.f32 %v204_v0, %v203_v51  ;;  %v208_v3 = vsel %vm73_vm0, %v194_v54, 0.0 }
 0x117   :  { %v207_v56 = vadd.f32 %v206_v55, %v205_v53 }
 0x119   :  { %v209_v57 = vadd.f32 %v208_v3, %v207_v56 }
 0x129   :  { %v227_v58 = vpop.permute.xlu0 %226 }
 0x12a   :  { %v229_v12 = vmul.f32 %v227_v58, %v209_v57 }
 0x12c   :  { %280 = vmatmul.msk.f32.vlgmr.msra.gmra.mxu0 %vm73_vm0, %v229_v12 }
 0x1a9   :  { %v258_v19 = vpop.f32.mrf.mxu0 }
 0x1aa   :  { %v259_v20 = vadd.f32 %v291_v59, %v258_v19 }
 0x1ac   :  { %261 = vst [vmem:[#allocation7] sm:$0xff] %v259_v20 }
 0x1ad   :  { %272 = dma.vmem_to_hbm [thread:$0]  %s268_s8, 128, %s270_s11, [#allocation4]  }
 0x1ae   :  { %386 = dma.done.wait [#allocation4], 128  }
 0x1af   :  { %387 = vsyncadd [#allocation4], 4294967168 }
 0x1b0   :  { %277 = vsyncpa [#allocation3], 1 }
 0x1b1   :  { %278 = vsyncpa [#allocation6], 1 }
 0x1b2   :  { %279 = vsyncpa [#allocation4], 1 }

</bundles_post_ra>
